<compile_context>
chip_gen: v6e
topology: v6e:2x2x1
jax: 0.10.0
libtpu: 0.0.40
codegen_flags: <defaults>
</compile_context>

<pallas_src>
import functools

import jax
import jax.numpy as jnp
from jax import lax
from jax.experimental import pallas as pl
from jax.experimental.pallas import tpu as pltpu


# --------------------------------------------------------------------------- #
# Kernel
# --------------------------------------------------------------------------- #
def _residual_kernel(xph_ref, w1s_ref, w2b_ref, sb_ref, out_ref, *,
                     B, Ho, s, Lin, Lout, P):
    """One grid step == one tile of B batch elements.

    xph_ref : (B, s, Hp, Lin)   padded input, split into `s` row-phase planes
                                (plane[p][r] == padded row r*s + p, W-flattened)
    w1s_ref : (3, Lin, 2*Lout)  conv1 bands (cols [0:Lout]) fused with the
                                shortcut band (cols [Lout:2*Lout], dy==1 only)
    w2b_ref : (3, Lout, Lout)   conv2 banded weights
    sb_ref  : (4, Lout)         rows = [bn1 scale, bn1 bias, bn2 scale, bn2 bias]
    out_ref : (B, Ho//P, P*Lout) lane-dense output tile
    """
    M = B * Ho
    mxu_dt = w2b_ref.dtype

    # ---- input row taps: contiguous sublane slices of the phase planes -----
    planes = [xph_ref[:, p] for p in range(s)]            # each (B, Hp, Lin)

    def xtap(dy):
        lo = dy // s
        return planes[dy % s][:, lo:lo + Ho, :].reshape(M, Lin)

    # ---- conv1 (3x3) + shortcut fused along N (one N=2*Lout dot per tap) ---
    acc = jnp.dot(xtap(0), w1s_ref[0], preferred_element_type=jnp.float32)
    acc = acc + jnp.dot(xtap(1), w1s_ref[1], preferred_element_type=jnp.float32)
    acc = acc + jnp.dot(xtap(2), w1s_ref[2], preferred_element_type=jnp.float32)
    acc1 = acc[:, :Lout]          # conv1 output
    res = acc[:, Lout:]           # shortcut output

    s1 = sb_ref[0:1, :]
    t1 = sb_ref[1:2, :]
    s2 = sb_ref[2:3, :]
    t2 = sb_ref[3:4, :]

    y1 = jnp.maximum(acc1 * s1 + t1, 0.0)                 # bn1 + relu, (M, Lout)

    # ---- conv2 (3x3, stride 1): row taps via XLU roll + boundary masks -----
    row = lax.broadcasted_iota(jnp.int32, (M, 1), 0)
    r = row % Ho
    y1_prev = jnp.where(r == 0, 0.0, pltpu.roll(y1, shift=1, axis=0))
    y1_next = jnp.where(r == Ho - 1, 0.0, pltpu.roll(y1, shift=M - 1, axis=0))

    acc2 = jnp.dot(y1_prev.astype(mxu_dt), w2b_ref[0],
                   preferred_element_type=jnp.float32)
    acc2 = acc2 + jnp.dot(y1.astype(mxu_dt), w2b_ref[1],
                          preferred_element_type=jnp.float32)
    acc2 = acc2 + jnp.dot(y1_next.astype(mxu_dt), w2b_ref[2],
                          preferred_element_type=jnp.float32)

    # ---- bn2 + residual add + relu, lane-dense packed store ----------------
    out = jnp.maximum(acc2 * s2 + t2 + res, 0.0)           # (M, Lout)
    out_ref[...] = out.reshape(B, Ho // P, P * Lout).astype(out_ref.dtype)


# --------------------------------------------------------------------------- #
# Wrapper helpers
# --------------------------------------------------------------------------- #
def _fold_bn(gamma, beta, mean, var, conv_bias, eps=1e-5):
    sc = gamma / jnp.sqrt(var + eps)
    return sc, sc * (conv_bias - mean) + beta


def _banded_weights(w, Win, Wo, stride, col_shift):
    """w: (3, 3, Ci, Co) -> (3, Win*Ci, Wo*Co) banded (column taps + stride folded)."""
    jw = jnp.arange(Win)
    j = jnp.arange(Wo)
    dx = jnp.arange(3)
    tgt = j[None, None, :] * stride + dx[:, None, None] + col_shift   # (3,1,Wo)
    sel = (jw[None, :, None] == tgt).astype(w.dtype)                  # (3,Win,Wo)
    band = jnp.einsum('xwj,yxio->ywijo', sel, w)                      # (3,Win,Ci,Wo,Co)
    Ci, Co = w.shape[2], w.shape[3]
    return band.reshape(3, Win * Ci, Wo * Co)


def _banded_pointwise(w2d, Win, Wo, stride, col_shift):
    """w2d: (Ci, Co) -> (Win*Ci, Wo*Co) banded 1x1-conv / identity matrix."""
    Ci, Co = w2d.shape
    jw = jnp.arange(Win)
    j = jnp.arange(Wo)
    sel = (jw[:, None] == (j[None, :] * stride + col_shift)).astype(w2d.dtype)
    return jnp.einsum('wj,io->wijo', sel, w2d).reshape(Win * Ci, Wo * Co)


def _vmem_budget_bytes():
    try:
        cap = int(pltpu.get_tpu_info().vmem_capacity_bytes)
    except Exception:
        cap = 64 << 20
    return max(cap // 6, 8 << 20)


def _pick_batch_tile(N, Ho, per_batch_bytes, fixed_bytes, budget):
    divs = [d for d in range(1, N + 1) if N % d == 0]
    feas = [d for d in divs if fixed_bytes + d * per_batch_bytes <= budget] or [1]
    # Keep >= 2 grid steps (so the "parallel" batch axis can split across the
    # two v7x TensorCores) only when each step still feeds the MXU with
    # M = B*Ho >= 256 rows; otherwise take the single biggest feasible step
    # (best on single-TensorCore v5e/v6e and at tiny N).
    target = [d for d in feas if N // d >= 2 and d * Ho >= 256]
    if target:
        return min(target, key=lambda d: (abs(d * Ho - 512), d))
    return max(feas)


# --------------------------------------------------------------------------- #
# Forward
# --------------------------------------------------------------------------- #
def residual_forward(x_nchw, params, *, use_1x1conv, strides=1,
                     mxu_dtype=jnp.float32):
    """x_nchw: (N, Cin, H, W) float32 -> (N, Cout, Ho, Wo)."""
    x = jnp.transpose(x_nchw, (0, 2, 3, 1)).astype(jnp.float32)       # NHWC
    N, H, W, Cin = x.shape
    Cout = params["w1"].shape[-1]
    s = int(strides)
    Ho = (H - 1) // s + 1
    Wo = (W - 1) // s + 1
    Wp = W + 2
    Lin = Wp * Cin
    Lout = Wo * Cout

    if not use_1x1conv:
        assert Cin == Cout and s == 1, (
            "identity shortcut requires input_channels == num_channels and stride == 1")

    # Row-pack factor so the stored last dim is lane-dense (multiple of 128).
    if Lout < 128 and 128 % Lout == 0 and Ho % (128 // Lout) == 0:
        P = 128 // Lout
    else:
        P = 1

    # Fold conv bias + eval-mode BatchNorm into per-channel scale/bias.
    s1, t1 = _fold_bn(params["g1"], params["beta1"], params["m1"], params["v1"],
                      params["b1"])
    s2, t2 = _fold_bn(params["g2"], params["beta2"], params["m2"], params["v2"],
                      params["b2"])
    if use_1x1conv:
        w_short = params["w3"][0, 0]                 # (Cin, Cout)
        t2 = t2 + params["b3"]                       # fold shortcut bias into bn2 bias
    else:
        w_short = jnp.eye(Cin, dtype=jnp.float32)    # identity shortcut

    # Banded weights; conv1 + shortcut fused along the MXU N dim.
    w1b = _banded_weights(params["w1"], Wp, Wo, s, 0)         # (3, Lin, Lout)
    wsb = _banded_pointwise(w_short, Wp, Wo, s, 1)            # (Lin, Lout)
    zeros = jnp.zeros_like(wsb)
    w1s = jnp.concatenate(
        [w1b, jnp.stack([zeros, wsb, zeros], axis=0)], axis=-1)  # (3, Lin, 2*Lout)
    w2b = _banded_weights(params["w2"], Wo, Wo, 1, -1)           # (3, Lout, Lout)

    # Packed per-lane scale/bias (lane index = j*Cout + co).
    sb = jnp.stack([jnp.tile(s1, Wo), jnp.tile(t1, Wo),
                    jnp.tile(s2, Wo), jnp.tile(t2, Wo)], axis=0)  # (4, Lout)

    # Padded, W-flattened input, split into `s` row-phase planes (pure reshape,
    # no 3x replication).  plane p, row r  ==  padded row r*s + p.
    Hp = Ho + (2 // s)
    xp = jnp.pad(x, ((0, 0), (1, 1), (1, 1), (0, 0))).reshape(N, H + 2, Lin)
    if Hp * s > H + 2:
        xp = jnp.pad(xp, ((0, 0), (0, Hp * s - (H + 2)), (0, 0)))
    xph = xp[:, :Hp * s].reshape(N, Hp, s, Lin).transpose(0, 2, 1, 3)  # (N,s,Hp,Lin)

    # Optional bf16 MXU inputs (recommended on v6e/v7x); accumulation stays f32.
    xph = xph.astype(mxu_dtype)
    w1s = w1s.astype(mxu_dtype)
    w2b = w2b.astype(mxu_dtype)
    in_bytes = 2 if mxu_dtype == jnp.bfloat16 else 4

    # VMEM-aware batch tiling.
    per_batch = (2 * (s * Hp * Lin * in_bytes + Ho * Lout * 4)
                 + 10 * Ho * max(2 * Lout, Lin) * 4)
    fixed = 2 * ((3 * Lin * 2 * Lout + 3 * Lout * Lout) * in_bytes
                 + 4 * Lout * 4)
    budget = _vmem_budget_bytes()
    B = _pick_batch_tile(N, Ho, per_batch, fixed, budget)
    grid = (N // B,)
    est = fixed + B * per_batch
    vmem_limit = (int(min(max(2 * est, 32 << 20), 48 << 20))
                  if est > (12 << 20) else None)

    kernel = functools.partial(_residual_kernel, B=B, Ho=Ho, s=s,
                               Lin=Lin, Lout=Lout, P=P)

    out_flat = pl.pallas_call(
        kernel,
        out_shape=jax.ShapeDtypeStruct((N, Ho // P, P * Lout), jnp.float32),
        grid_spec=pltpu.PrefetchScalarGridSpec(
            num_scalar_prefetch=0,
            grid=grid,
            in_specs=[
                pl.BlockSpec((B, s, Hp, Lin), lambda b: (b, 0, 0, 0)),
                pl.BlockSpec((3, Lin, 2 * Lout), lambda b: (0, 0, 0)),
                pl.BlockSpec((3, Lout, Lout), lambda b: (0, 0, 0)),
                pl.BlockSpec((4, Lout), lambda b: (0, 0)),
            ],
            out_specs=pl.BlockSpec((B, Ho // P, P * Lout), lambda b: (b, 0, 0)),
        ),
        compiler_params=pltpu.CompilerParams(
            dimension_semantics=("parallel",),
            vmem_limit_bytes=vmem_limit),
    )(xph, w1s, w2b, sb)

    out = out_flat.reshape(N, Ho, Wo, Cout)
    return jnp.transpose(out, (0, 3, 1, 2))                 # back to NCHW


# --------------------------------------------------------------------------- #
# Plain-JAX reference (eval-mode BN), used for validation
# --------------------------------------------------------------------------- #
def residual_reference(x_nchw, params, *, use_1x1conv, strides=1):
    x = jnp.transpose(x_nchw, (0, 2, 3, 1)).astype(jnp.float32)
    eps = 1e-5
    dn = ("NHWC", "HWIO", "NHWC")

    def conv(inp, w, b, stride, pad):
        y = lax.conv_general_dilated(inp, w, (stride, stride), pad,
                                     dimension_numbers=dn)
        return y + b

    def bn(y, g, beta, m, v):
        return g * (y - m) / jnp.sqrt(v + eps) + beta

    y = conv(x, params["w1"], params["b1"], strides, ((1, 1), (1, 1)))
    y = jax.nn.relu(bn(y, params["g1"], params["beta1"], params["m1"], params["v1"]))
    y = conv(y, params["w2"], params["b2"], 1, ((1, 1), (1, 1)))
    y = bn(y, params["g2"], params["beta2"], params["m2"], params["v2"])
    if use_1x1conv:
        xr = conv(x, params["w3"], params["b3"], strides, ((0, 0), (0, 0)))
    else:
        xr = x
    out = jax.nn.relu(y + xr)
    return jnp.transpose(out, (0, 3, 1, 2))


def make_params(key, Cin, Cout, use_1x1conv):
    ks = jax.random.split(key, 16)
    p = {
        "w1": 0.1 * jax.random.normal(ks[0], (3, 3, Cin, Cout), jnp.float32),
        "b1": 0.1 * jax.random.normal(ks[1], (Cout,), jnp.float32),
        "w2": 0.1 * jax.random.normal(ks[2], (3, 3, Cout, Cout), jnp.float32),
        "b2": 0.1 * jax.random.normal(ks[3], (Cout,), jnp.float32),
        "g1": 1.0 + 0.1 * jax.random.normal(ks[4], (Cout,), jnp.float32),
        "beta1": 0.1 * jax.random.normal(ks[5], (Cout,), jnp.float32),
        "m1": 0.05 * jax.random.normal(ks[6], (Cout,), jnp.float32),
        "v1": 1.0 + 0.1 * jnp.abs(jax.random.normal(ks[7], (Cout,), jnp.float32)),
        "g2": 1.0 + 0.1 * jax.random.normal(ks[8], (Cout,), jnp.float32),
        "beta2": 0.1 * jax.random.normal(ks[9], (Cout,), jnp.float32),
        "m2": 0.05 * jax.random.normal(ks[10], (Cout,), jnp.float32),
        "v2": 1.0 + 0.1 * jnp.abs(jax.random.normal(ks[11], (Cout,), jnp.float32)),
    }
    if use_1x1conv:
        p["w3"] = 0.1 * jax.random.normal(ks[12], (1, 1, Cin, Cout), jnp.float32)
        p["b3"] = 0.1 * jax.random.normal(ks[13], (Cout,), jnp.float32)
    return p


if __name__ == "__main__":
    key = jax.random.PRNGKey(0)
    k_x1, k_p1, k_x2, k_p2, k_x3, k_p3 = jax.random.split(key, 6)

    # Config A: channel change via 1x1 conv on the shortcut, stride 1.
    N, Cin, H, W, Cout = 2, 4, 16, 16, 8
    x_a = jax.random.normal(k_x1, (N, Cin, H, W), jnp.float32)
    p_a = make_params(k_p1, Cin, Cout, use_1x1conv=True)
    out_a = jax.block_until_ready(
        residual_forward(x_a, p_a, use_1x1conv=True, strides=1))
    ref_a = residual_reference(x_a, p_a, use_1x1conv=True, strides=1)
    assert out_a.shape == (N, Cout, H, W)
    assert jnp.allclose(out_a, ref_a, atol=1e-4, rtol=1e-4)

    # Config B: identity shortcut (Cin == Cout, stride 1).
    x_b = jax.random.normal(k_x2, (N, Cout, H, W), jnp.float32)
    p_b = make_params(k_p2, Cout, Cout, use_1x1conv=False)
    out_b = jax.block_until_ready(
        residual_forward(x_b, p_b, use_1x1conv=False, strides=1))
    ref_b = residual_reference(x_b, p_b, use_1x1conv=False, strides=1)
    assert out_b.shape == (N, Cout, H, W)
    assert jnp.allclose(out_b, ref_b, atol=1e-4, rtol=1e-4)

    # Config C: downsampling block (stride 2) with 1x1 conv shortcut
    # (exercises the lane-dense row-packed output path).
    x_c = jax.random.normal(k_x3, (N, Cin, H, W), jnp.float32)
    p_c = make_params(k_p3, Cin, Cout, use_1x1conv=True)
    out_c = jax.block_until_ready(
        residual_forward(x_c, p_c, use_1x1conv=True, strides=2))
    ref_c = residual_reference(x_c, p_c, use_1x1conv=True, strides=2)
    assert out_c.shape == (N, Cout, H // 2, W // 2)
    assert jnp.allclose(out_c, ref_c, atol=1e-4, rtol=1e-4)

    # Config D: bf16 MXU fast path (v6e/v7x) — f32 accumulation, looser check.
    out_d = jax.block_until_ready(
        residual_forward(x_a, p_a, use_1x1conv=True, strides=1,
                         mxu_dtype=jnp.bfloat16))
    assert out_d.shape == (N, Cout, H, W)
    assert jnp.allclose(out_d, ref_a, atol=5e-2, rtol=5e-2)

    print("KERNEL_OK")
</pallas_src>

<mosaic_0001>
module attributes {stable_mosaic.version = 11 : i64} {
  func.func @_residual_kernel(%arg0: i32, %arg1: memref<2x1x18x72xf32, #tpu.memory_space<vmem>>, %arg2: memref<3x72x256xf32, #tpu.memory_space<vmem>>, %arg3: memref<3x128x128xf32, #tpu.memory_space<vmem>>, %arg4: memref<4x128xf32, #tpu.memory_space<vmem>>, %arg5: memref<2x16x128xf32, #tpu.memory_space<vmem>>) attributes {dimension_semantics = [#tpu.dimension_semantics<parallel>], iteration_bounds = array<i64: 1>, scalar_prefetch = 0 : i64, scratch_operands = 0 : i64, tpu.core_type = #tpu.core_type<tc>, window_params = [{transform_indices = @transform_0, window_bounds = array<i64: 2, 1, 18, 72>}, {pipeline_mode = #tpu.pipeline_mode<synchronous>, transform_indices = @transform_1, window_bounds = array<i64: 3, 72, 256>}, {pipeline_mode = #tpu.pipeline_mode<synchronous>, transform_indices = @transform_2, window_bounds = array<i64: 3, 128, 128>}, {pipeline_mode = #tpu.pipeline_mode<synchronous>, transform_indices = @transform_3, window_bounds = array<i64: 4, 128>}, {transform_indices = @transform_4, window_bounds = array<i64: 2, 16, 128>}]} {
    %c0 = arith.constant 0 : index
    %c0_0 = arith.constant 0 : index
    %c0_1 = arith.constant 0 : index
    %c0_2 = arith.constant 0 : index
    %0 = vector.load %arg1[%c0, %c0_0, %c0_1, %c0_2] : memref<2x1x18x72xf32, #tpu.memory_space<vmem>>, vector<2x1x18x72xf32>
    %1 = vector.shape_cast %0 : vector<2x1x18x72xf32> to vector<2x18x72xf32>
    %2 = vector.extract_strided_slice %1 {offsets = [0, 0, 0], sizes = [2, 16, 72], strides = [1, 1, 1]} : vector<2x18x72xf32> to vector<2x16x72xf32>
    %3 = vector.shape_cast %2 : vector<2x16x72xf32> to vector<32x72xf32>
    %c0_3 = arith.constant 0 : index
    %c0_4 = arith.constant 0 : index
    %c0_5 = arith.constant 0 : index
    %4 = vector.load %arg2[%c0_3, %c0_4, %c0_5] : memref<3x72x256xf32, #tpu.memory_space<vmem>>, vector<1x72x256xf32>
    %5 = vector.shape_cast %4 : vector<1x72x256xf32> to vector<72x256xf32>
    %cst = arith.constant dense<0.000000e+00> : vector<32x256xf32>
    %6 = tpu.matmul %3, %5, %cst {dimension_numbers = #tpu.dot_dimension_numbers<[1], [0], [0], [1], [0, 0, 1, 1], [], []>} : vector<32x72xf32>, vector<72x256xf32>, vector<32x256xf32> -> vector<32x256xf32>
    %7 = vector.extract_strided_slice %1 {offsets = [0, 1, 0], sizes = [2, 16, 72], strides = [1, 1, 1]} : vector<2x18x72xf32> to vector<2x16x72xf32>
    %8 = vector.shape_cast %7 : vector<2x16x72xf32> to vector<32x72xf32>
    %c1 = arith.constant 1 : index
    %c0_6 = arith.constant 0 : index
    %c0_7 = arith.constant 0 : index
    %9 = vector.load %arg2[%c1, %c0_6, %c0_7] : memref<3x72x256xf32, #tpu.memory_space<vmem>>, vector<1x72x256xf32>
    %10 = vector.shape_cast %9 : vector<1x72x256xf32> to vector<72x256xf32>
    %cst_8 = arith.constant dense<0.000000e+00> : vector<32x256xf32>
    %11 = tpu.matmul %8, %10, %cst_8 {dimension_numbers = #tpu.dot_dimension_numbers<[1], [0], [0], [1], [0, 0, 1, 1], [], []>} : vector<32x72xf32>, vector<72x256xf32>, vector<32x256xf32> -> vector<32x256xf32>
    %12 = arith.addf %6, %11 : vector<32x256xf32>
    %13 = vector.extract_strided_slice %1 {offsets = [0, 2, 0], sizes = [2, 16, 72], strides = [1, 1, 1]} : vector<2x18x72xf32> to vector<2x16x72xf32>
    %14 = vector.shape_cast %13 : vector<2x16x72xf32> to vector<32x72xf32>
    %c2 = arith.constant 2 : index
    %c0_9 = arith.constant 0 : index
    %c0_10 = arith.constant 0 : index
    %15 = vector.load %arg2[%c2, %c0_9, %c0_10] : memref<3x72x256xf32, #tpu.memory_space<vmem>>, vector<1x72x256xf32>
    %16 = vector.shape_cast %15 : vector<1x72x256xf32> to vector<72x256xf32>
    %cst_11 = arith.constant dense<0.000000e+00> : vector<32x256xf32>
    %17 = tpu.matmul %14, %16, %cst_11 {dimension_numbers = #tpu.dot_dimension_numbers<[1], [0], [0], [1], [0, 0, 1, 1], [], []>} : vector<32x72xf32>, vector<72x256xf32>, vector<32x256xf32> -> vector<32x256xf32>
    %18 = arith.addf %12, %17 : vector<32x256xf32>
    %19 = vector.extract_strided_slice %18 {offsets = [0, 0], sizes = [32, 128], strides = [1, 1]} : vector<32x256xf32> to vector<32x128xf32>
    %20 = vector.extract_strided_slice %18 {offsets = [0, 128], sizes = [32, 128], strides = [1, 1]} : vector<32x256xf32> to vector<32x128xf32>
    %c0_12 = arith.constant 0 : index
    %c0_13 = arith.constant 0 : index
    %21 = vector.load %arg4[%c0_12, %c0_13] : memref<4x128xf32, #tpu.memory_space<vmem>>, vector<1x128xf32>
    %c1_14 = arith.constant 1 : index
    %c0_15 = arith.constant 0 : index
    %22 = vector.load %arg4[%c1_14, %c0_15] : memref<4x128xf32, #tpu.memory_space<vmem>>, vector<1x128xf32>
    %c2_16 = arith.constant 2 : index
    %c0_17 = arith.constant 0 : index
    %23 = vector.load %arg4[%c2_16, %c0_17] : memref<4x128xf32, #tpu.memory_space<vmem>>, vector<1x128xf32>
    %c3 = arith.constant 3 : index
    %c0_18 = arith.constant 0 : index
    %24 = vector.load %arg4[%c3, %c0_18] : memref<4x128xf32, #tpu.memory_space<vmem>>, vector<1x128xf32>
    %25 = vector.broadcast %21 : vector<1x128xf32> to vector<32x128xf32>
    %26 = arith.mulf %19, %25 : vector<32x128xf32>
    %27 = vector.broadcast %22 : vector<1x128xf32> to vector<32x128xf32>
    %28 = arith.addf %26, %27 : vector<32x128xf32>
    %cst_19 = arith.constant 0.000000e+00 : f32
    %29 = vector.broadcast %cst_19 : f32 to vector<32x128xf32>
    %30 = arith.maximumf %28, %29 : vector<32x128xf32>
    %31 = tpu.iota {dimensions = array<i32: 0>} : vector<32x1xi32>
    %c16_i32 = arith.constant 16 : i32
    %c0_i32 = arith.constant 0 : i32
    %32 = arith.cmpi eq, %c16_i32, %c0_i32 : i32
    %c1_i32 = arith.constant 1 : i32
    %33 = arith.select %32, %c1_i32, %c16_i32 : i32
    %34 = vector.broadcast %33 : i32 to vector<32x1xi32>
    %35 = arith.remsi %31, %34 : vector<32x1xi32>
    %c0_i32_20 = arith.constant 0 : i32
    %36 = vector.broadcast %c0_i32_20 : i32 to vector<32x1xi32>
    %37 = arith.cmpi ne, %35, %36 : vector<32x1xi32>
    %c0_i32_21 = arith.constant 0 : i32
    %38 = vector.broadcast %c0_i32_21 : i32 to vector<32x1xi32>
    %39 = arith.cmpi slt, %35, %38 : vector<32x1xi32>
    %c0_i32_22 = arith.constant 0 : i32
    %40 = arith.cmpi slt, %33, %c0_i32_22 : i32
    %41 = vector.broadcast %40 : i1 to vector<32x1xi1>
    %42 = vector.broadcast %41 : vector<32x1xi1> to vector<32x1xi1>
    %43 = arith.xori %39, %42 : vector<32x1xi1>
    %44 = arith.andi %43, %37 : vector<32x1xi1>
    %45 = vector.broadcast %33 : i32 to vector<32x1xi32>
    %46 = arith.addi %35, %45 : vector<32x1xi32>
    %47 = arith.select %44, %46, %35 : vector<32x1xi1>, vector<32x1xi32>
    %c0_i32_23 = arith.constant 0 : i32
    %48 = vector.broadcast %c0_i32_23 : i32 to vector<32x1xi32>
    %49 = arith.cmpi eq, %47, %48 : vector<32x1xi32>
    %c1_i32_24 = arith.constant 1 : i32
    %50 = tpu.dynamic_rotate %30 by %c1_i32_24 dim 0 : vector<32x128xf32>, i32 -> vector<32x128xf32>
    %cst_25 = arith.constant 0.000000e+00 : f32
    %51 = vector.shape_cast %49 : vector<32x1xi1> to vector<32x1xi1>
    %52 = vector.broadcast %51 : vector<32x1xi1> to vector<32x128xi1>
    %53 = vector.broadcast %cst_25 : f32 to vector<32x128xf32>
    %54 = arith.select %52, %53, %50 : vector<32x128xi1>, vector<32x128xf32>
    %c15_i32 = arith.constant 15 : i32
    %55 = vector.broadcast %c15_i32 : i32 to vector<32x1xi32>
    %56 = arith.cmpi eq, %47, %55 : vector<32x1xi32>
    %c31_i32 = arith.constant 31 : i32
    %57 = tpu.dynamic_rotate %30 by %c31_i32 dim 0 : vector<32x128xf32>, i32 -> vector<32x128xf32>
    %cst_26 = arith.constant 0.000000e+00 : f32
    %58 = vector.shape_cast %56 : vector<32x1xi1> to vector<32x1xi1>
    %59 = vector.broadcast %58 : vector<32x1xi1> to vector<32x128xi1>
    %60 = vector.broadcast %cst_26 : f32 to vector<32x128xf32>
    %61 = arith.select %59, %60, %57 : vector<32x128xi1>, vector<32x128xf32>
    %c0_27 = arith.constant 0 : index
    %c0_28 = arith.constant 0 : index
    %c0_29 = arith.constant 0 : index
    %62 = vector.load %arg3[%c0_27, %c0_28, %c0_29] : memref<3x128x128xf32, #tpu.memory_space<vmem>>, vector<1x128x128xf32>
    %63 = vector.shape_cast %62 : vector<1x128x128xf32> to vector<128x128xf32>
    %cst_30 = arith.constant dense<0.000000e+00> : vector<32x128xf32>
    %64 = tpu.matmul %54, %63, %cst_30 {dimension_numbers = #tpu.dot_dimension_numbers<[1], [0], [0], [1], [0, 0, 1, 1], [], []>} : vector<32x128xf32>, vector<128x128xf32>, vector<32x128xf32> -> vector<32x128xf32>
    %c1_31 = arith.constant 1 : index
    %c0_32 = arith.constant 0 : index
    %c0_33 = arith.constant 0 : index
    %65 = vector.load %arg3[%c1_31, %c0_32, %c0_33] : memref<3x128x128xf32, #tpu.memory_space<vmem>>, vector<1x128x128xf32>
    %66 = vector.shape_cast %65 : vector<1x128x128xf32> to vector<128x128xf32>
    %cst_34 = arith.constant dense<0.000000e+00> : vector<32x128xf32>
    %67 = tpu.matmul %30, %66, %cst_34 {dimension_numbers = #tpu.dot_dimension_numbers<[1], [0], [0], [1], [0, 0, 1, 1], [], []>} : vector<32x128xf32>, vector<128x128xf32>, vector<32x128xf32> -> vector<32x128xf32>
    %68 = arith.addf %64, %67 : vector<32x128xf32>
    %c2_35 = arith.constant 2 : index
    %c0_36 = arith.constant 0 : index
    %c0_37 = arith.constant 0 : index
    %69 = vector.load %arg3[%c2_35, %c0_36, %c0_37] : memref<3x128x128xf32, #tpu.memory_space<vmem>>, vector<1x128x128xf32>
    %70 = vector.shape_cast %69 : vector<1x128x128xf32> to vector<128x128xf32>
    %cst_38 = arith.constant dense<0.000000e+00> : vector<32x128xf32>
    %71 = tpu.matmul %61, %70, %cst_38 {dimension_numbers = #tpu.dot_dimension_numbers<[1], [0], [0], [1], [0, 0, 1, 1], [], []>} : vector<32x128xf32>, vector<128x128xf32>, vector<32x128xf32> -> vector<32x128xf32>
    %72 = arith.addf %68, %71 : vector<32x128xf32>
    %73 = vector.broadcast %23 : vector<1x128xf32> to vector<32x128xf32>
    %74 = arith.mulf %72, %73 : vector<32x128xf32>
    %75 = vector.broadcast %24 : vector<1x128xf32> to vector<32x128xf32>
    %76 = arith.addf %74, %75 : vector<32x128xf32>
    %77 = arith.addf %76, %20 : vector<32x128xf32>
    %cst_39 = arith.constant 0.000000e+00 : f32
    %78 = vector.broadcast %cst_39 : f32 to vector<32x128xf32>
    %79 = arith.maximumf %77, %78 : vector<32x128xf32>
    %80 = vector.shape_cast %79 : vector<32x128xf32> to vector<2x16x128xf32>
    %c0_40 = arith.constant 0 : index
    %c0_41 = arith.constant 0 : index
    %c0_42 = arith.constant 0 : index
    %81 = vector.load %arg5[%c0_40, %c0_41, %c0_42] : memref<2x16x128xf32, #tpu.memory_space<vmem>>, vector<2x16x128xf32>
    tpu.vector_store %arg5[%c0_40, %c0_41, %c0_42], %80 {strides = array<i32>} : memref<2x16x128xf32, #tpu.memory_space<vmem>>, vector<2x16x128xf32>,
    return
  }
  func.func @transform_0(%arg0: i32) -> (i32, i32, i32, i32) {
    %c0_i32 = arith.constant 0 : i32
    %c0_i32_0 = arith.constant 0 : i32
    %c0_i32_1 = arith.constant 0 : i32
    %c0_i32_2 = arith.constant 0 : i32
    return %arg0, %c0_i32, %c0_i32_0, %c0_i32_1 : i32, i32, i32, i32
  }
  func.func @transform_1(%arg0: i32) -> (i32, i32, i32) {
    %c0_i32 = arith.constant 0 : i32
    %c0_i32_0 = arith.constant 0 : i32
    %c0_i32_1 = arith.constant 0 : i32
    %c0_i32_2 = arith.constant 0 : i32
    return %c0_i32, %c0_i32_0, %c0_i32_1 : i32, i32, i32
  }
  func.func @transform_2(%arg0: i32) -> (i32, i32, i32) {
    %c0_i32 = arith.constant 0 : i32
    %c0_i32_0 = arith.constant 0 : i32
    %c0_i32_1 = arith.constant 0 : i32
    %c0_i32_2 = arith.constant 0 : i32
    return %c0_i32, %c0_i32_0, %c0_i32_1 : i32, i32, i32
  }
  func.func @transform_3(%arg0: i32) -> (i32, i32) {
    %c0_i32 = arith.constant 0 : i32
    %c0_i32_0 = arith.constant 0 : i32
    %c0_i32_1 = arith.constant 0 : i32
    return %c0_i32, %c0_i32_0 : i32, i32
  }
  func.func @transform_4(%arg0: i32) -> (i32, i32, i32) {
    %c0_i32 = arith.constant 0 : i32
    %c0_i32_0 = arith.constant 0 : i32
    %c0_i32_1 = arith.constant 0 : i32
    return %arg0, %c0_i32, %c0_i32_0 : i32, i32, i32
  }
}

</mosaic_0001>

<bundles_post_ra>
// kernel: tpu_custom_call.1
= control target key start
LH: loop header
LB: loop body
LE: loop exit
PB: predicated region body
PF: predicated region fallthrough
CT: control target
= control target key end

     0   :  { %9 = vsyncpa [#allocation3], 0  ;;  %s1396_s0 = inlined_call_operand.vmem [shape: f32[2,1,18,72], index: 0, kind: input, shape index: {}]   ;;  %s1397_s1 = inlined_call_operand.hbm [shape: f32[3,72,256], index: 1, kind: input, shape index: {}]   ;;  %s1398_s2 = inlined_call_operand.hbm [shape: f32[3,128,128], index: 2, kind: input, shape index: {}]   ;;  %s1399_s3 = inlined_call_operand.vmem [shape: f32[4,128], index: 3, kind: input, shape index: {}]   ;;  %s1400_s4 = inlined_call_operand.hbm [shape: f32[2,16,128], index: 4, kind: output, shape index: {}]  }
   0x1   :  { %10 = vsyncpa [#allocation6], 0 }
   0x2   :  { %11 = vsyncpa [#allocation4], 0  ;;  %s1194_s15 = smov [#allocation2]  }
   0x3   :  { %s19_s16 = sshll.u32 %s1194_s15, 4  ;;  %s20_s16 = int_to_ptr.vmem [resolvable:$true] %s19_s16 }
   0x4   :  { %s1136_s17 = scalar_lea.vmem %s20_s16, 6912  ;;  %p1141_p1 = scmp.lt.s32.totalorder %s20_s16, %s20_s16 }
   0x5   :  { %p1137_p0 = scmp.ne.s32.totalorder %s20_s16, %s1136_s17  ;;  %p1142_p2 = scmp.lt.s32.totalorder %s1136_s17, %s1136_s17 }
   0x7   :  { %p1143_p3 = por %p1142_p2, %p1141_p1 }
   0x9   :  { %p1144_p4 = pnand %p1143_p3, %p1137_p0 }
   0xb   :  { %1147 = shalt.err (!%p1144_p4)
}
   0xc   :  { %s1195_s18 = smov 256   ;;  %s1196_s19 = smov 16  }
   0xd   :  { %25 = dma.hbm_to_vmem [thread:$0]  %s1397_s1, 6912, %s20_s16, [#allocation3], %s1195_s18, %s1195_s18, %s1196_s19  }
   0xe   :  { %s1197_s22 = smov [#allocation5]  }
   0xf   :  { %s31_s23 = sshll.u32 %s1197_s22, 4  ;;  %s32_s23 = int_to_ptr.vmem [resolvable:$true] %s31_s23 }
  0x10   :  { %s1156_s24 = scalar_lea.vmem %s32_s23, 6144  ;;  %p1161_p6 = scmp.lt.s32.totalorder %s32_s23, %s32_s23 }
  0x11   :  { %p1157_p5 = scmp.ne.s32.totalorder %s32_s23, %s1156_s24  ;;  %p1162_p7 = scmp.lt.s32.totalorder %s1156_s24, %s1156_s24 }
  0x13   :  { %p1163_p8 = por %p1162_p7, %p1161_p6 }
  0x15   :  { %p1164_p9 = pnand %p1163_p8, %p1157_p5 }
  0x17   :  { %1167 = shalt.err (!%p1164_p9)
}
  0x18   :  { %s1198_s25 = smov 128   ;;  %s1199_s26 = smov 8  }
  0x19   :  { %37 = dma.hbm_to_vmem [thread:$0]  %s1398_s2, 6144, %s32_s23, [#allocation6], %s1198_s25, %s1198_s25, %s1199_s26  }
  0x1a   :  { %1188 = dma.done.wait [#allocation3], 6912  }
  0x1b   :  { %1189 = vsyncadd [#allocation3], 4294960384 }
  0x1c   :  { %1190 = dma.done.wait [#allocation6], 6144  }
  0x1d   :  { %1191 = vsyncadd [#allocation6], 4294961152  ;;  %v1200_v0 = vmov 0.0   ;;  %v105_v1 = vld [vmem:[#allocation2 + $0x118] sm:$0xff]  ;;  %v69_v2 = vld [vmem:[#allocation2 + $0x88] sm:$0xff]  ;;  %vm76_vm0 = vcmask 1046528  }
  0x1e   :  { %179 = vmatprep.mubr.f32.mxu0 %v1200_v0  ;;  %276 = vmatprep.mubr.f32.mxu1 %v1200_v0  ;;  %v104_v3 = vld [vmem:[#allocation2 + $0x110] sm:$0xff]  ;;  %v68_v4 = vld [vmem:[#allocation2 + $0x80] sm:$0xff]  ;;  %v103_v5 = vld [vmem:[#allocation2 + $0x108] sm:$0xff]  ;;  %vm106_vm1 = vcmask 588800   ;;  %vm301_vm2 = vcmask 1045504  }
  0x1f   :  { %129 = vmatprep.subr.mxu0 %v105_v1  ;;  %226 = vmatprep.subr.mxu1 %v69_v2  ;;  %v67_v6 = vld [vmem:[#allocation2 + $0x78] sm:$0xff]  ;;  %v102_v7 = vld [vmem:[#allocation2 + $0x100] sm:$0xff]  ;;  %v66_v8 = vld [vmem:[#allocation2 + $0x70] sm:$0xff] }
  0x20   :  { %130 = vmatpush1.msra.mxu0 %v104_v3  ;;  %227 = vmatpush1.msra.mxu1 %v68_v4  ;;  %v101_v9 = vld [vmem:[#allocation2 + $0xf8] sm:$0xff]  ;;  %v65_v10 = vld [vmem:[#allocation2 + $0x68] sm:$0xff]  ;;  %v100_v11 = vld [vmem:[#allocation2 + $0xf0] sm:$0xff] }
  0x21   :  { %131 = vmatprep.subr.mxu0 %v103_v5  ;;  %228 = vmatprep.subr.mxu1 %v67_v6  ;;  %v64_v12 = vld [vmem:[#allocation2 + $0x60] sm:$0xff]  ;;  %v99_v13 = vld [vmem:[#allocation2 + $0xe8] sm:$0xff]  ;;  %v63_v14 = vld [vmem:[#allocation2 + $0x58] sm:$0xff] }
  0x22   :  { %132 = vmatpush1.msra.mxu0 %v102_v7  ;;  %229 = vmatpush1.msra.mxu1 %v66_v8  ;;  %v98_v15 = vld [vmem:[#allocation2 + $0xe0] sm:$0xff]  ;;  %v62_v16 = vld [vmem:[#allocation2 + $0x50] sm:$0xff]  ;;  %v97_v17 = vld [vmem:[#allocation2 + $0xd8] sm:$0xff] }
  0x23   :  { %133 = vmatprep.subr.mxu0 %v101_v9  ;;  %230 = vmatprep.subr.mxu1 %v65_v10  ;;  %v61_v18 = vld [vmem:[#allocation2 + $0x48] sm:$0xff]  ;;  %v96_v19 = vld [vmem:[#allocation2 + $0xd0] sm:$0xff]  ;;  %v60_v20 = vld [vmem:[#allocation2 + $0x40] sm:$0xff] }
  0x24   :  { %134 = vmatpush1.msra.mxu0 %v100_v11  ;;  %231 = vmatpush1.msra.mxu1 %v64_v12  ;;  %v95_v21 = vld [vmem:[#allocation2 + $0xc8] sm:$0xff]  ;;  %v59_v22 = vld [vmem:[#allocation2 + $0x38] sm:$0xff]  ;;  %v94_v23 = vld [vmem:[#allocation2 + $0xc0] sm:$0xff] }
  0x25   :  { %135 = vmatprep.subr.mxu0 %v99_v13  ;;  %232 = vmatprep.subr.mxu1 %v63_v14  ;;  %v58_v24 = vld [vmem:[#allocation2 + $0x30] sm:$0xff]  ;;  %v93_v25 = vld [vmem:[#allocation2 + $0xb8] sm:$0xff]  ;;  %v57_v26 = vld [vmem:[#allocation2 + $0x28] sm:$0xff] }
  0x26   :  { %136 = vmatpush1.msra.mxu0 %v98_v15  ;;  %233 = vmatpush1.msra.mxu1 %v62_v16  ;;  %v92_v27 = vld [vmem:[#allocation2 + $0xb0] sm:$0xff]  ;;  %v56_v28 = vld [vmem:[#allocation2 + $0x20] sm:$0xff]  ;;  %v91_v29 = vld [vmem:[#allocation2 + $0xa8] sm:$0xff] }
  0x27   :  { %137 = vmatprep.subr.mxu0 %v97_v17  ;;  %234 = vmatprep.subr.mxu1 %v61_v18  ;;  %v55_v30 = vld [vmem:[#allocation2 + $0x18] sm:$0xff]  ;;  %v1241_v31 = vld [vmem:[%s1396_s0] sm:$0xff]  ;;  %v1246_v32 = vld [vmem:[%s1396_s0 + $0x8] sm:$0xff] }
  0x28   :  { %138 = vmatpush1.msra.mxu0 %v96_v19  ;;  %235 = vmatpush1.msra.mxu1 %v60_v20  ;;  %v90_v33 = vld [vmem:[#allocation2 + $0xa0] sm:$0xff]  ;;  %v54_v34 = vld [vmem:[#allocation2 + $0x10] sm:$0xff]  ;;  %v77_v35 = vrot.slane %v1241_v31, 1  ;;  %v78_v36 = vrot.slane %v1246_v32, 1  ;;  %v89_v37 = vld [vmem:[#allocation2 + $0x98] sm:$0xff]  ;;  %v302_v5 = vrot.slane %v1241_v31, 2 }
  0x29   :  { %139 = vmatprep.subr.mxu0 %v95_v21  ;;  %236 = vmatprep.subr.mxu1 %v59_v22  ;;  %v53_v38 = vld [vmem:[#allocation2 + $0x8] sm:$0xff]  ;;  %v1253_v39 = vld [vmem:[%s1396_s0 + $0x10] sm:$0x3]  ;;  %v52_v41 = vld [vmem:[#allocation2] sm:$0xff]  ;;  %v303_v6 = vrot.slane %v1246_v32, 2 }
  0x2a   :  { %140 = vmatpush1.msra.mxu0 %v94_v23  ;;  %237 = vmatpush1.msra.mxu1 %v58_v24  ;;  %v88_v40 = vld [vmem:[#allocation2 + $0x90] sm:$0xff]  ;;  %v79_v42 = vsel %vm76_vm0, %v77_v35, %v78_v36  ;;  %v330_v43 = vld [vmem:[#allocation2 + $0x1a8] sm:$0xff]  ;;  %v80_v44 = vrot.slane %v1253_v39, 1  ;;  %v329_v45 = vld [vmem:[#allocation2 + $0x1a0] sm:$0xff]  ;;  %v305_v12 = vrot.slane %v1253_v39, 2 }
  0x2b   :  { %141 = vmatprep.subr.mxu0 %v93_v25  ;;  %238 = vmatprep.subr.mxu1 %v57_v26  ;;  %v1260_v46 = vld [vmem:[%s1396_s0 + $0x18] sm:$0xff]  ;;  %v1265_v47 = vld [vmem:[%s1396_s0 + $0x20] sm:$0xff]  ;;  %v327_v49 = vld [vmem:[#allocation2 + $0x190] sm:$0xff]  ;;  %v304_v11 = vsel %vm301_vm2, %v302_v5, %v303_v6 }
  0x2c   :  { %142 = vmatpush1.msra.mxu0 %v92_v27  ;;  %239 = vmatpush1.msra.mxu1 %v56_v28  ;;  %v328_v48 = vld [vmem:[#allocation2 + $0x198] sm:$0xff]  ;;  %v595_v50 = vld [vmem:[#allocation5 + $0xf8] sm:$0xff]  ;;  %v81_v51 = vsel %vm76_vm0, %v78_v36, %v80_v44  ;;  %v82_v53 = vrot.slane %v1260_v46, 1  ;;  %v83_v54 = vrot.slane %v1265_v47, 1  ;;  %v325_v55 = vld [vmem:[#allocation2 + $0x180] sm:$0xff]  ;;  %v306_v13 = vsel %vm301_vm2, %v303_v6, %v305_v12 }
  0x2d   :  { %143 = vmatprep.subr.mxu0 %v91_v29  ;;  %240 = vmatprep.subr.mxu1 %v55_v30  ;;  %v326_v52 = vld [vmem:[#allocation2 + $0x188] sm:$0xff]  ;;  %v324_v57 = vld [vmem:[#allocation2 + $0x178] sm:$0xff]  ;;  %v323_v58 = vld [vmem:[#allocation2 + $0x170] sm:$0xff]  ;;  %v307_v14 = vrot.slane %v1260_v46, 2  ;;  %v308_v15 = vrot.slane %v1265_v47, 2 }
  0x2e   :  { %144 = vmatpush1.msra.mxu0 %v90_v33  ;;  %241 = vmatpush1.msra.mxu1 %v54_v34  ;;  %v51_v56 = vld [vmem:[%s1396_s0 + $0x28] sm:$0x3]  ;;  %v84_v59 = vsel %vm76_vm0, %v82_v53, %v83_v54  ;;  %v321_v62 = vld [vmem:[#allocation2 + $0x160] sm:$0xff]  ;;  %v320_v63 = vld [vmem:[#allocation2 + $0x158] sm:$0xff] }
  0x2f   :  { %145 = vmatprep.subr.mxu0 %v89_v37  ;;  %242 = vmatprep.subr.mxu1 %v53_v38  ;;  %v322_v60 = vld [vmem:[#allocation2 + $0x168] sm:$0xff]  ;;  %v85_v61 = vrot.slane %v51_v56, 1  ;;  %v319_v1 = vld [vmem:[#allocation2 + $0x150] sm:$0xff]  ;;  %v317_v4 = vld [vmem:[#allocation2 + $0x140] sm:$0xff]  ;;  %v309_v16 = vsel %vm301_vm2, %v307_v14, %v308_v15  ;;  %v310_v17 = vrot.slane %v51_v56, 2 }
  0x30   :  { %146 = vmatpush1.msra.mxu0 %v88_v40  ;;  %243 = vmatpush1.msra.mxu1 %v52_v41  ;;  %v318_v3 = vld [vmem:[#allocation2 + $0x148] sm:$0xff]  ;;  %v316_v7 = vld [vmem:[#allocation2 + $0x138] sm:$0xff]  ;;  %v315_v8 = vld [vmem:[#allocation2 + $0x130] sm:$0xff] }
  0x31   :  { %918 = vmatmul.mubr.msk.f32.vlgmr.msra.gmra.mxu0 %vm106_vm1, %v79_v42  ;;  %922 = vmatmul.mubr.msk.f32.vlgmr.msra.gmra.mxu1 %vm106_vm1, %v1241_v31  ;;  %v86_v2 = vsel %vm76_vm0, %v83_v54, %v85_v61  ;;  %v314_v9 = vld [vmem:[#allocation2 + $0x128] sm:$0xff]  ;;  %v313_v10 = vld [vmem:[#allocation2 + $0x120] sm:$0xff]  ;;  %v311_v18 = vsel %vm301_vm2, %v308_v15, %v310_v17  ;;  %v593_v20 = vld [vmem:[#allocation5 + $0xe8] sm:$0xff] }
  0x32   :  { %353 = vmatprep.subr.mxu0 %v330_v43  ;;  %185 = vmatprep.mubr.f32.mxu0 %v1200_v0  ;;  %v594_v19 = vld [vmem:[#allocation5 + $0xf0] sm:$0xff]  ;;  %v592_v21 = vld [vmem:[#allocation5 + $0xe0] sm:$0xff]  ;;  %v591_v22 = vld [vmem:[#allocation5 + $0xd8] sm:$0xff] }
  0x33   :  { %354 = vmatpush1.msra.mxu0 %v329_v45  ;;  %282 = vmatprep.mubr.f32.mxu1 %v1200_v0  ;;  %v590_v23 = vld [vmem:[#allocation5 + $0xd0] sm:$0xff]  ;;  %v578_v24 = vld [vmem:[#allocation5 + $0x78] sm:$0xff]  ;;  %v588_v25 = vld [vmem:[#allocation5 + $0xc0] sm:$0xff] }
  0x34   :  { %355 = vmatprep.subr.mxu0 %v328_v48  ;;  %1006 = vmatprep.subr.mxu1 %v595_v50  ;;  %v577_v26 = vld [vmem:[#allocation5 + $0x70] sm:$0xff]  ;;  %v587_v27 = vld [vmem:[#allocation5 + $0xb8] sm:$0xff]  ;;  %v576_v28 = vld [vmem:[#allocation5 + $0x68] sm:$0xff] }
  0x35   :  { %356 = vmatpush1.msra.mxu0 %v327_v49  ;;  %923 = vmatmul.mubr.msk.f32.gmra.mxu1 %vm106_vm1, %v1246_v32  ;;  %v586_v29 = vld [vmem:[#allocation5 + $0xb0] sm:$0xff]  ;;  %v575_v30 = vld [vmem:[#allocation5 + $0x60] sm:$0xff]  ;;  %v585_v31 = vld [vmem:[#allocation5 + $0xa8] sm:$0xff] }
  0x36   :  { %919 = vmatmul.mubr.msk.f32.gmra.mxu0 %vm106_vm1, %v81_v51  ;;  %357 = vmatprep.subr.mxu0 %v326_v52  ;;  %v574_v32 = vld [vmem:[#allocation5 + $0x58] sm:$0xff]  ;;  %v584_v33 = vld [vmem:[#allocation5 + $0xa0] sm:$0xff]  ;;  %v573_v34 = vld [vmem:[#allocation5 + $0x50] sm:$0xff] }
  0x37   :  { %358 = vmatpush1.msra.mxu0 %v325_v55  ;;  %191 = vmatprep.mubr.f32.mxu0 %v1200_v0  ;;  %v583_v35 = vld [vmem:[#allocation5 + $0x98] sm:$0xff]  ;;  %v572_v36 = vld [vmem:[#allocation5 + $0x48] sm:$0xff]  ;;  %v582_v37 = vld [vmem:[#allocation5 + $0x90] sm:$0xff] }
  0x38   :  { %359 = vmatprep.subr.mxu0 %v324_v57  ;;  %288 = vmatprep.mubr.f32.mxu1 %v1200_v0  ;;  %v571_v38 = vld [vmem:[#allocation5 + $0x40] sm:$0xff]  ;;  %v581_v39 = vld [vmem:[#allocation5 + $0x88] sm:$0xff]  ;;  %v570_v40 = vld [vmem:[#allocation5 + $0x38] sm:$0xff] }
  0x39   :  { %360 = vmatpush1.msra.mxu0 %v323_v58  ;;  %924 = vmatmul.mubr.msk.f32.gmra.mxu1 %vm106_vm1, %v1260_v46  ;;  %v580_v41 = vld [vmem:[#allocation5 + $0x80] sm:$0xff]  ;;  %v569_v42 = vld [vmem:[#allocation5 + $0x30] sm:$0xff]  ;;  %v1310_v43 = vld [vmem:[#allocation5 + $0x178] sm:$0xff] }
  0x3a   :  { %920 = vmatmul.mubr.msk.f32.gmra.mxu0 %vm106_vm1, %v84_v59  ;;  %361 = vmatprep.subr.mxu0 %v322_v60  ;;  %v568_v44 = vld [vmem:[#allocation5 + $0x28] sm:$0xff]  ;;  %v567_v45 = vld [vmem:[#allocation5 + $0x20] sm:$0xff]  ;;  %v566_v46 = vld [vmem:[#allocation5 + $0x18] sm:$0xff] }
  0x3b   :  { %362 = vmatpush1.msra.mxu0 %v321_v62  ;;  %197 = vmatprep.mubr.f32.mxu0 %v1200_v0  ;;  %v564_v48 = vld [vmem:[#allocation5 + $0x8] sm:$0xff]  ;;  %v563_v49 = vld [vmem:[#allocation5] sm:$0xff]  ;;  %v930_v6 = vld [vmem:[%s1399_s3] ss:$0 sm:$0xff] }
  0x3c   :  { %363 = vmatprep.subr.mxu0 %v320_v63  ;;  %294 = vmatprep.mubr.f32.mxu1 %v1200_v0 }
  0x3d   :  { %364 = vmatpush1.msra.mxu0 %v319_v1  ;;  %925 = vmatmul.mubr.msk.f32.gmra.mxu1 %vm106_vm1, %v1265_v47  ;;  %v565_v47 = vld [vmem:[#allocation5 + $0x10] sm:$0xff] }
  0x3e   :  { %921 = vmatmul.mubr.msk.f32.gmra.mxu0 %vm106_vm1, %v86_v2  ;;  %365 = vmatprep.subr.mxu0 %v318_v3 }
  0x3f   :  { %366 = vmatpush1.msra.mxu0 %v317_v4  ;;  %403 = vmatprep.mubr.f32.mxu0 %v1200_v0 }
  0x40   :  { %367 = vmatprep.subr.mxu0 %v316_v7  ;;  %1007 = vmatpush3.msra.mxu1 %v595_v50 }
  0x41   :  { %368 = vmatpush1.msra.mxu0 %v315_v8  ;;  %1008 = vmatprep.subr.mxu1 %v594_v19 }
  0x42   :  { %369 = vmatprep.subr.mxu0 %v314_v9  ;;  %1009 = vmatpush3.msra.mxu1 %v594_v19  ;;  %v931_v9 = vld [vmem:[%s1399_s3 + $0x1] ss:$0 sm:$0xff] }
  0x43   :  { %370 = vmatpush1.msra.mxu0 %v313_v10  ;;  %1010 = vmatprep.subr.mxu1 %v593_v20 }
  0x44   :  { %926 = vmatmul.mubr.msk.f32.vlgmr.msra.gmra.mxu0 %vm106_vm1, %v304_v11  ;;  %1011 = vmatpush3.msra.mxu1 %v593_v20 }
  0x45   :  { %409 = vmatprep.mubr.f32.mxu0 %v1200_v0  ;;  %1012 = vmatprep.subr.mxu1 %v592_v21 }
  0x46   :  { %1013 = vmatpush3.msra.mxu1 %v592_v21  ;;  %1044 = vmatprep.subr.mxu0 %v578_v24 }
  0x47   :  { %1014 = vmatprep.subr.mxu1 %v591_v22  ;;  %1045 = vmatpush3.msra.mxu0 %v578_v24 }
  0x48   :  { %927 = vmatmul.mubr.msk.f32.gmra.mxu0 %vm106_vm1, %v306_v13  ;;  %1015 = vmatpush3.msra.mxu1 %v591_v22 }
  0x49   :  { %415 = vmatprep.mubr.f32.mxu0 %v1200_v0  ;;  %1016 = vmatprep.subr.mxu1 %v590_v23 }
  0x4a   :  { %1017 = vmatpush3.msra.mxu1 %v590_v23  ;;  %1046 = vmatprep.subr.mxu0 %v577_v26 }
  0x4b   :  { %1047 = vmatpush3.msra.mxu0 %v577_v26 }
  0x4c   :  { %928 = vmatmul.mubr.msk.f32.gmra.mxu0 %vm106_vm1, %v309_v16  ;;  %1048 = vmatprep.subr.mxu0 %v576_v28 }
  0x4d   :  { %421 = vmatprep.mubr.f32.mxu0 %v1200_v0  ;;  %v589_v0 = vld [vmem:[#allocation5 + $0xc8] sm:$0xff]  ;;  %1049 = vmatpush3.msra.mxu0 %v576_v28 }
  0x4e   :  { %1018 = vmatprep.subr.mxu1 %v589_v0  ;;  %1050 = vmatprep.subr.mxu0 %v575_v30 }
  0x4f   :  { %1019 = vmatpush3.msra.mxu1 %v589_v0  ;;  %1051 = vmatpush3.msra.mxu0 %v575_v30  ;;  %v460_v0 = vlaneseq }
  0x50   :  { %929 = vmatmul.mubr.msk.f32.gmra.mxu0 %vm106_vm1, %v311_v18  ;;  %1020 = vmatprep.subr.mxu1 %v588_v25 }
  0x51   :  { %1021 = vmatpush3.msra.mxu1 %v588_v25  ;;  %1052 = vmatprep.subr.mxu0 %v574_v32 }
  0x52   :  { %1022 = vmatprep.subr.mxu1 %v587_v27  ;;  %1053 = vmatpush3.msra.mxu0 %v574_v32 }
  0x53   :  { %1023 = vmatpush3.msra.mxu1 %v587_v27  ;;  %1054 = vmatprep.subr.mxu0 %v573_v34 }
  0x54   :  { %1024 = vmatprep.subr.mxu1 %v586_v29  ;;  %1055 = vmatpush3.msra.mxu0 %v573_v34  ;;  %v1333_v34 = vshrl.u32 %v460_v0, 7 }
  0x55   :  { %1025 = vmatpush3.msra.mxu1 %v586_v29  ;;  %1056 = vmatprep.subr.mxu0 %v572_v36 }
  0x56   :  { %1026 = vmatprep.subr.mxu1 %v585_v31  ;;  %1057 = vmatpush3.msra.mxu0 %v572_v36  ;;  %vm546_vm3 = vcmp.lt.s32.totalorder %v1333_v34, 7  ;;  %vm521_vm4 = vcmp.lt.s32.totalorder %v1333_v34, 1 }
  0x57   :  { %1027 = vmatpush3.msra.mxu1 %v585_v31  ;;  %1058 = vmatprep.subr.mxu0 %v571_v38  ;;  %v781_v31 = vld [vmem:[#allocation5 + $0x170] sm:$0xff] }
  0x58   :  { %1028 = vmatprep.subr.mxu1 %v584_v33  ;;  %1059 = vmatpush3.msra.mxu0 %v571_v38  ;;  %v463_v38 = vadd.s32 16, %v1333_v34 }
  0x59   :  { %1029 = vmatpush3.msra.mxu1 %v584_v33  ;;  %1060 = vmatprep.subr.mxu0 %v570_v40 }
  0x5a   :  { %1030 = vmatprep.subr.mxu1 %v583_v35  ;;  %1061 = vmatpush3.msra.mxu0 %v570_v40  ;;  %v469_v40 = vand.u32 15, %v1333_v34 }
  0x5b   :  { %1031 = vmatpush3.msra.mxu1 %v583_v35  ;;  %1062 = vmatprep.subr.mxu0 %v569_v42  ;;  %v780_v35 = vld [vmem:[#allocation5 + $0x168] sm:$0xff] }
  0x5c   :  { %1032 = vmatprep.subr.mxu1 %v582_v37  ;;  %1063 = vmatpush3.msra.mxu0 %v569_v42  ;;  %vm942_vm5 = vcmp.ne.s32.totalorder %v469_v40, 0 }
  0x5d   :  { %1033 = vmatpush3.msra.mxu1 %v582_v37  ;;  %1064 = vmatprep.subr.mxu0 %v568_v44 }
  0x5e   :  { %1034 = vmatprep.subr.mxu1 %v581_v39  ;;  %1065 = vmatpush3.msra.mxu0 %v568_v44  ;;  %v778_v44 = vld [vmem:[#allocation5 + $0x158] sm:$0xff] }
  0x5f   :  { %1035 = vmatpush3.msra.mxu1 %v581_v39  ;;  %1066 = vmatprep.subr.mxu0 %v567_v45  ;;  %v779_v39 = vld [vmem:[#allocation5 + $0x160] sm:$0xff] }
  0x60   :  { %1036 = vmatprep.subr.mxu1 %v580_v41  ;;  %1067 = vmatpush3.msra.mxu0 %v567_v45 }
  0x61   :  { %1037 = vmatpush3.msra.mxu1 %v580_v41  ;;  %1068 = vmatprep.subr.mxu0 %v566_v46 }
  0x62   :  { %1082 = vmatprep.subr.mxu1 %v1310_v43  ;;  %1069 = vmatpush3.msra.mxu0 %v566_v46  ;;  %v483_v46 = vand.u32 15, %v463_v38 }
  0x63   :  { %1070 = vmatprep.subr.mxu0 %v565_v47 }
  0x64   :  { %1071 = vmatpush3.msra.mxu0 %v565_v47  ;;  %vm943_vm6 = vcmp.ne.s32.totalorder %v483_v46, 0 }
  0x65   :  { %1072 = vmatprep.subr.mxu0 %v564_v48 }
  0x66   :  { %1073 = vmatpush3.msra.mxu0 %v564_v48  ;;  %v777_v48 = vld [vmem:[#allocation5 + $0x150] sm:$0xff] }
  0x67   :  { %1074 = vmatprep.subr.mxu0 %v563_v49 }
  0x68   :  { %1075 = vmatpush3.msra.mxu0 %v563_v49 }
  0xf1   :  { %v181_v50 = vpop.f32.mrf.mxu0  ;;  %v278_v51 = vpop.f32.mrf.mxu1 }
  0xf2   :  { %v279_v4 = vadd.f32 %v278_v51, %v181_v50 }
  0xf3   :  { %v183_v52 = vpop.f32.mrf.mxu0  ;;  %v280_v53 = vpop.f32.mrf.mxu1 }
  0xf4   :  { %v281_v54 = vadd.f32 %v280_v53, %v183_v52  ;;  %v776_v53 = vld [vmem:[#allocation5 + $0x148] sm:$0xff] }
  0xf5   :  { %v284_v55 = vpop.f32.mrf.mxu1 }
  0xf6   :  { %v187_v56 = vpop.f32.mrf.mxu0 }
  0xf7   :  { %v286_v57 = vpop.f32.mrf.mxu1  ;;  %v285_v10 = vadd.f32 %v284_v55, %v187_v56  ;;  %v775_v56 = vld [vmem:[#allocation5 + $0x140] sm:$0xff] }
  0xf8   :  { %v189_v58 = vpop.f32.mrf.mxu0 }
  0xf9   :  { %v287_v59 = vadd.f32 %v286_v57, %v189_v58  ;;  %v290_v60 = vpop.f32.mrf.mxu1  ;;  %v774_v58 = vld [vmem:[#allocation5 + $0x138] sm:$0xff] }
  0xfa   :  { %v193_v61 = vpop.f32.mrf.mxu0 }
  0xfb   :  { %v292_v62 = vpop.f32.mrf.mxu1  ;;  %v291_v17 = vadd.f32 %v290_v60, %v193_v61  ;;  %v773_v60 = vld [vmem:[#allocation5 + $0x130] sm:$0xff]  ;;  %v772_v61 = vld [vmem:[#allocation5 + $0x128] sm:$0xff] }
  0xfc   :  { %v195_v63 = vpop.f32.mrf.mxu0 }
  0xfd   :  { %v293_v1 = vadd.f32 %v292_v62, %v195_v63  ;;  %v296_v24 = vpop.f32.mrf.mxu1  ;;  %v771_v62 = vld [vmem:[#allocation5 + $0x120] sm:$0xff]  ;;  %v770_v63 = vld [vmem:[#allocation5 + $0x118] sm:$0xff] }
  0xfe   :  { %v199_v2 = vpop.f32.mrf.mxu0 }
  0xff   :  { %v297_v26 = vadd.f32 %v296_v24, %v199_v2  ;;  %v769_v2 = vld [vmem:[#allocation5 + $0x110] sm:$0xff] }
 0x100   :  { %v1313_v3 = vpop.f32.mrf.mxu0 }
 0x104   :  { %v405_v5 = vpop.f32.mrf.mxu0 }
 0x105   :  { %v428_v7 = vadd.f32 %v405_v5, %v279_v4  ;;  %v768_v4 = vld [vmem:[#allocation5 + $0x108] sm:$0xff] }
 0x106   :  { %v407_v8 = vpop.f32.mrf.mxu0 }
 0x107   :  { %v444_v11 = vmul.f32 %v930_v6, %v428_v7  ;;  %v1321_v12 = vadd.f32 %v407_v8, %v281_v54  ;;  %v767_v8 = vld [vmem:[#allocation5 + $0x100] sm:$0xff] }
 0x108   :  { %v411_v13 = vpop.f32.mrf.mxu0 }
 0x109   :  { %v430_v14 = vadd.f32 %v411_v13, %v285_v10  ;;  %v452_v15 = vadd.f32 %v931_v9, %v444_v11 }
 0x10a   :  { %v413_v16 = vpop.f32.mrf.mxu0 }
 0x10b   :  { %v445_v18 = vmul.f32 %v930_v6, %v430_v14  ;;  %v1323_v19 = vadd.f32 %v413_v16, %v287_v59  ;;  %v1325_v20 = vmax.f32 %v452_v15, 0.0  ;;  %v298_v15 = vpop.f32.mrf.mxu1 }
 0x10c   :  { %v417_v21 = vpop.f32.mrf.mxu0 }
 0x10d   :  { %v453_v22 = vadd.f32 %v931_v9, %v445_v18  ;;  %v432_v23 = vadd.f32 %v417_v21, %v291_v17  ;;  %1038 = vmatprep.mubr.f32.mxu1 %v1325_v20  ;;  %v542_v45 = vrot.slane %v1325_v20, 1  ;;  %v517_v50 = vrot.slane %v1325_v20, 7 }
 0x10e   :  { %v419_v25 = vpop.f32.mrf.mxu0 }
 0x10f   :  { %v1328_v27 = vmax.f32 %v453_v22, 0.0  ;;  %v446_v28 = vmul.f32 %v930_v6, %v432_v23  ;;  %v1330_v29 = vadd.f32 %v419_v25, %v293_v1  ;;  %v462_v1 = vadd.s32 8, %v1333_v34 }
 0x110   :  { %v423_v30 = vpop.f32.mrf.mxu0 }
 0x111   :  { %v434_v32 = vadd.f32 %v423_v30, %v297_v26  ;;  %1039 = vmatmul.mubr.f32.vlgmr.msra.gmra.mxu1 %v1328_v27  ;;  %v454_v33 = vadd.f32 %v931_v9, %v446_v28  ;;  %v543_v42 = vrot.slane %v1328_v27, 1  ;;  %v518_v47 = vrot.slane %v1328_v27, 7  ;;  %v940_v26 = vld [vmem:[%s1399_s3 + $0x2] ss:$0 sm:$0xff] }
 0x112   :  { %1083 = vmatpush3.msra.mxu1 %v1310_v43  ;;  %v476_v5 = vand.u32 15, %v462_v1  ;;  %v425_v16 = vpop.f32.mrf.mxu0 }
 0x113   :  { %v447_v36 = vmul.f32 %v930_v6, %v434_v32  ;;  %1084 = vmatprep.subr.mxu1 %v781_v31  ;;  %v1336_v37 = vmax.f32 %v454_v33, 0.0  ;;  %v549_v49 = vsel %vm546_vm3, %v542_v45, %v543_v42  ;;  %v524_v55 = vsel %vm521_vm4, %v517_v50, %v518_v47 }
 0x114   :  { %1085 = vmatpush3.msra.mxu1 %v781_v31  ;;  %v464_v6 = vadd.s32 24, %v1333_v34  ;;  %vm944_vm7 = vcmp.ne.s32.totalorder %v476_v5, 15  ;;  %v941_v31 = vld [vmem:[%s1399_s3 + $0x3] ss:$0 sm:$0xff]  ;;  %s1201_s3 = smov [#allocation7]  }
 0x115   :  { %1086 = vmatprep.subr.mxu1 %v780_v35  ;;  %1041 = vmatprep.mubr.f32.mxu1 %v1336_v37  ;;  %v455_v41 = vadd.f32 %v931_v9, %v447_v36  ;;  %v519_v52 = vrot.slane %v1336_v37, 7  ;;  %v544_v7 = vrot.slane %v1336_v37, 1  ;;  %s905_s20 = sshll.u32 %s1201_s3, 4  ;;  %s906_s20 = int_to_ptr.vmem [resolvable:$true] %s905_s20 }
 0x116   :  { %1087 = vmatpush3.msra.mxu1 %v780_v35  ;;  %v490_v10 = vand.u32 15, %v464_v6  ;;  %s1168_s21 = scalar_lea.vmem %s906_s20, 512  ;;  %p1173_p11 = scmp.lt.s32.totalorder %s906_s20, %s906_s20 }
 0x117   :  { %1088 = vmatprep.subr.mxu1 %v779_v39  ;;  %v1343_v43 = vmax.f32 %v455_v41, 0.0  ;;  %v523_v57 = vsel %vm521_vm4, %v518_v47, %v519_v52  ;;  %v548_v11 = vsel %vm546_vm3, %v543_v42, %v544_v7  ;;  %v299_v41 = vadd.f32 %v298_v15, %v1313_v3  ;;  %p1169_p10 = scmp.ne.s32.totalorder %s906_s20, %s1168_s21  ;;  %p1174_p12 = scmp.lt.s32.totalorder %s1168_s21, %s1168_s21 }
 0x118   :  { %1089 = vmatpush3.msra.mxu1 %v779_v39  ;;  %vm945_vm8 = vcmp.ne.s32.totalorder %v490_v10, 15 }
 0x119   :  { %1090 = vmatprep.subr.mxu1 %v778_v44  ;;  %1042 = vmatmul.mubr.f32.gmra.mxu1 %v1343_v43  ;;  %v520_v51 = vrot.slane %v1343_v43, 7  ;;  %v545_v9 = vrot.slane %v1343_v43, 1  ;;  %v435_v47 = vadd.f32 %v425_v16, %v299_v41  ;;  %p1175_p13 = por %p1174_p12, %p1173_p11 }
 0x11a   :  { %1091 = vmatpush3.msra.mxu1 %v778_v44  ;;  %1114 = vmatprep.mubr.f32.mxu1 %v549_v49 }
 0x11b   :  { %1092 = vmatprep.subr.mxu1 %v777_v48  ;;  %v525_v54 = vsel %vm521_vm4, %v520_v51, %v517_v50  ;;  %v522_v59 = vsel %vm521_vm4, %v519_v52, %v520_v51  ;;  %v547_v13 = vsel %vm546_vm3, %v544_v7, %v545_v9  ;;  %v550_v14 = vsel %vm546_vm3, %v545_v9, %v542_v45  ;;  %p1176_p0 = pnand %p1175_p13, %p1169_p10 }
 0x11c   :  { %1093 = vmatpush3.msra.mxu1 %v777_v48  ;;  %1076 = vmatprep.mubr.msk.f32.mxu0 %vm942_vm5, %v525_v54 }
 0x11d   :  { %1094 = vmatprep.subr.mxu1 %v776_v53  ;;  %1077 = vmatmul.mubr.f32.vlgmr.msra.gmra.mxu0 %v524_v55 }
 0x11e   :  { %1095 = vmatpush3.msra.mxu1 %v776_v53  ;;  %1079 = vmatprep.mubr.msk.f32.mxu0 %vm943_vm6, %v523_v57 }
 0x11f   :  { %1096 = vmatprep.subr.mxu1 %v775_v56 }
 0x120   :  { %1097 = vmatpush3.msra.mxu1 %v775_v56 }
 0x121   :  { %1098 = vmatprep.subr.mxu1 %v774_v58  ;;  %1080 = vmatmul.mubr.f32.gmra.mxu0 %v522_v59 }
 0x122   :  { %1099 = vmatpush3.msra.mxu1 %v774_v58 }
 0x123   :  { %1100 = vmatprep.subr.mxu1 %v773_v60 }
 0x124   :  { %1101 = vmatpush3.msra.mxu1 %v773_v60 }
 0x125   :  { %1102 = vmatprep.subr.mxu1 %v772_v61 }
 0x126   :  { %1103 = vmatpush3.msra.mxu1 %v772_v61 }
 0x127   :  { %1104 = vmatprep.subr.mxu1 %v771_v62 }
 0x128   :  { %1105 = vmatpush3.msra.mxu1 %v771_v62 }
 0x129   :  { %1106 = vmatprep.subr.mxu1 %v770_v63 }
 0x12a   :  { %1107 = vmatpush3.msra.mxu1 %v770_v63 }
 0x12b   :  { %1108 = vmatprep.subr.mxu1 %v769_v2 }
 0x12c   :  { %1109 = vmatpush3.msra.mxu1 %v769_v2 }
 0x12d   :  { %1110 = vmatprep.subr.mxu1 %v768_v4 }
 0x12e   :  { %1111 = vmatpush3.msra.mxu1 %v768_v4 }
 0x12f   :  { %1112 = vmatprep.subr.mxu1 %v767_v8 }
 0x130   :  { %1113 = vmatpush3.msra.mxu1 %v767_v8 }
 0x131   :  { %1115 = vmatmul.mubr.msk.f32.vlgmr.msra.gmra.mxu1 %vm944_vm7, %v548_v11 }
 0x132   :  { %1117 = vmatprep.mubr.f32.mxu1 %v547_v13 }
 0x135   :  { %1118 = vmatmul.mubr.msk.f32.gmra.mxu1 %vm945_vm8, %v550_v14 }
 0x1d1   :  { %v1040_v17 = vpop.f32.mrf.mxu1 }
 0x1d3   :  { %v662_v21 = vpop.f32.mrf.mxu1 }
 0x1d9   :  { %v1043_v22 = vpop.f32.mrf.mxu1 }
 0x1db   :  { %v672_v0 = vpop.f32.mrf.mxu1 }
 0x1dd   :  { %v1078_v18 = vpop.f32.mrf.mxu0 }
 0x1de   :  { %v753_v25 = vadd.f32 %v1078_v18, %v1040_v17 }
 0x1df   :  { %v747_v23 = vpop.f32.mrf.mxu0 }
 0x1e0   :  { %v748_v20 = vadd.f32 %v747_v23, %v662_v21 }
 0x1e1   :  { %v1081_v24 = vpop.f32.mrf.mxu0 }
 0x1e2   :  { %v763_v33 = vadd.f32 %v1081_v24, %v1043_v22 }
 0x1e3   :  { %v757_v30 = vpop.f32.mrf.mxu0 }
 0x1e4   :  { %v758_v37 = vadd.f32 %v757_v30, %v672_v0 }
 0x1f1   :  { %v1116_v27 = vpop.f32.mrf.mxu1 }
 0x1f2   :  { %v869_v28 = vadd.f32 %v1116_v27, %v753_v25 }
 0x1f3   :  { %v849_v32 = vpop.f32.mrf.mxu1 }
 0x1f4   :  { %v877_v34 = vmul.f32 %v940_v26, %v869_v28  ;;  %v868_v35 = vadd.f32 %v849_v32, %v748_v20 }
 0x1f5   :  { %v1119_v36 = vpop.f32.mrf.mxu1 }
 0x1f6   :  { %v885_v38 = vadd.f32 %v941_v31, %v877_v34  ;;  %v876_v39 = vmul.f32 %v940_v26, %v868_v35  ;;  %v871_v40 = vadd.f32 %v1119_v36, %v763_v33 }
 0x1f7   :  { %v859_v42 = vpop.f32.mrf.mxu1 }
 0x1f8   :  { %v889_v44 = vadd.f32 %v885_v38, %v1323_v19  ;;  %v884_v43 = vadd.f32 %v941_v31, %v876_v39  ;;  %v879_v45 = vmul.f32 %v940_v26, %v871_v40  ;;  %v870_v46 = vadd.f32 %v859_v42, %v758_v37 }
 0x1fa   :  { %v893_v48 = vmax.f32 %v889_v44, 0.0  ;;  %v888_v49 = vadd.f32 %v884_v43, %v1321_v12  ;;  %v887_v50 = vadd.f32 %v941_v31, %v879_v45  ;;  %v878_v51 = vmul.f32 %v940_v26, %v870_v46 }
 0x1fc   :  { %897 = vst [vmem:[#allocation7 + $0x8] sm:$0xff] %v893_v48  ;;  %v892_v52 = vmax.f32 %v888_v49, 0.0  ;;  %v891_v53 = vadd.f32 %v887_v50, %v435_v47  ;;  %v886_v54 = vadd.f32 %v941_v31, %v878_v51 }
 0x1fe   :  { %896 = vst [vmem:[#allocation7] sm:$0xff] %v892_v52  ;;  %v895_v3 = vmax.f32 %v891_v53, 0.0  ;;  %v890_v55 = vadd.f32 %v886_v54, %v1330_v29 }
 0x200   :  { %899 = vst [vmem:[#allocation7 + $0x18] sm:$0xff] %v895_v3  ;;  %v894_v19 = vmax.f32 %v890_v55, 0.0 }
 0x202   :  { %898 = vst [vmem:[#allocation7 + $0x10] sm:$0xff] %v894_v19 }
 0x203   :  { %1179 = shalt.err (!%p1176_p0)
}
 0x204   :  { %911 = dma.vmem_to_hbm [thread:$0]  %s906_s20, 512, %s1400_s4, [#allocation4], %s1198_s25, %s1198_s25, %s1199_s26  }
 0x205   :  { %1192 = dma.done.wait [#allocation4], 512  }
 0x206   :  { %1193 = vsyncadd [#allocation4], 4294966784 }
 0x207   :  { %915 = vsyncpa [#allocation3], 1 }
 0x208   :  { %916 = vsyncpa [#allocation6], 1 }
 0x209   :  { %917 = vsyncpa [#allocation4], 1 }

</bundles_post_ra>
